<compile_context>
chip_gen: v6e
topology: v6e:2x2x1
jax: 0.10.0
libtpu: 0.0.40
codegen_flags: <defaults>
</compile_context>

<pallas_src>
import jax
import jax.numpy as jnp
from jax.experimental import pallas as pl
from jax.experimental.pallas import tpu as pltpu


def _round_up(n, m):
    return ((n + m - 1) // m) * m


def _pack_decoder_consts(params):
    """Pack every weight / per-channel parameter into one (rows, lanes) f32
    buffer with 8-row-aligned blocks. Runs once at build time."""
    w1, b1, g1, be1, wt, bt, g2, be2, w3, b3 = params
    H, F, _ = w1.shape
    H2 = wt.shape[1]
    lanes = max(128, _round_up(H, 128))

    blocks, offsets = [], []
    row = [0]

    def add(block):
        block = jnp.asarray(block, jnp.float32)
        r, c = block.shape
        rp = _round_up(r, 8)
        blocks.append(jnp.pad(block, ((0, rp - r), (0, lanes - c))))
        offsets.append(row[0])
        row[0] += rp

    # Conv1 taps: tap k multiplies x[t+k-1]; W_k = w1[:, :, k].T  (F, H)
    for k in range(3):
        add(jnp.transpose(w1[:, :, k]))
    # ConvT taps: W_k = wt[:, :, k]  (H, H2)   (PyTorch layout: in, out, k)
    for k in range(4):
        add(wt[:, :, k])
    # Conv3 taps packed for output lanes [e0, e1, o0, o1]:
    #   y_even = odd[t-1]@V0 + even[t]@V1 + odd[t]@V2
    #   y_odd  = even[t]@V0 + odd[t]@V1  + even[t+1]@V2
    V = [jnp.transpose(w3[:, :, k]).astype(jnp.float32) for k in range(3)]  # (H2, 2)
    z = jnp.zeros((H2, 2), jnp.float32)
    add(jnp.concatenate([V[0], z], axis=1))      # multiplies shift_prev(odd)
    add(jnp.concatenate([V[1], V[0]], axis=1))   # multiplies even
    add(jnp.concatenate([V[2], V[1]], axis=1))   # multiplies odd
    add(jnp.concatenate([z, V[2]], axis=1))      # multiplies shift_next(even)

    # Per-channel params, one per row.  (b1 / bt intentionally dropped: exactly
    # absorbed by the training-mode BatchNorm that follows each of those convs.)
    def rowvec(v):
        v = jnp.asarray(v, jnp.float32)
        return jnp.pad(v, (0, lanes - v.shape[0]))[None, :]

    b3p = jnp.concatenate([jnp.asarray(b3, jnp.float32)] * 2)  # [b3_0, b3_1, b3_0, b3_1]
    add(jnp.concatenate([rowvec(g1), rowvec(be1), rowvec(g2), rowvec(be2),
                         rowvec(b3p)], axis=0))

    consts = jnp.concatenate(blocks, axis=0)
    o_w1 = tuple(offsets[0:3])
    o_wt = tuple(offsets[3:7])
    o_w3 = tuple(offsets[7:11])
    o_pp = offsets[11]
    return consts, (F, H, H2), (o_w1, o_wt, o_w3, o_pp)


def _make_kernel(N, L, F, H, H2, offs):
    NL = N * L
    eps = 1e-5
    o_w1, o_wt, o_w3, o_pp = offs

    def kernel(x_ref, c_ref, out_ref):
        bf16 = jnp.bfloat16
        # --- static slices of the single constants buffer (free) ---
        w1 = [c_ref[o:o + F, 0:H].astype(bf16) for o in o_w1]     # 3 x (F, H)
        wt = [c_ref[o:o + H, 0:H2].astype(bf16) for o in o_wt]    # 4 x (H, H2)
        w3 = [c_ref[o:o + H2, 0:4].astype(bf16) for o in o_w3]    # 4 x (H2, 4)
        g1 = c_ref[o_pp + 0:o_pp + 1, 0:H]
        be1 = c_ref[o_pp + 1:o_pp + 2, 0:H]
        g2 = c_ref[o_pp + 2:o_pp + 3, 0:H2]
        be2 = c_ref[o_pp + 3:o_pp + 4, 0:H2]
        b3 = c_ref[o_pp + 4:o_pp + 5, 0:4]

        # --- within-sequence shift helpers on flattened (N*L, C) slabs ---
        # roll wraps across batch boundaries, but those rows are exactly the
        # ones masked to zero, so the flattened form is safe.
        t_idx = jax.lax.broadcasted_iota(jnp.int32, (NL, 1), 0) % L
        not_first = t_idx != 0
        not_last = t_idx != (L - 1)

        def shift_prev(a):  # a[t] -> a[t-1], zero at t == 0
            return jnp.where(not_first, pltpu.roll(a, shift=1, axis=0), 0.0)

        def shift_next(a):  # a[t] -> a[t+1], zero at t == L-1
            return jnp.where(not_last, pltpu.roll(a, shift=NL - 1, axis=0), 0.0)

        def mm(a, w):       # bf16 operands, f32 accumulation on the MXU
            return jnp.dot(a.astype(bf16), w, preferred_element_type=jnp.float32)

        x = x_ref[...]                                      # (NL, F) f32

        # --- Conv1d(F->H, k=3, pad=1): per-tap dots (bias absorbed by BN) ---
        h_pre = mm(shift_prev(x), w1[0]) + mm(x, w1[1]) + mm(shift_next(x), w1[2])

        # --- BatchNorm1d(H), single-pass batch stats, folded scale/shift + ReLU ---
        inv1 = 1.0 / float(NL)
        m1 = jnp.sum(h_pre, axis=0, keepdims=True) * inv1
        v1 = jnp.sum(h_pre * h_pre, axis=0, keepdims=True) * inv1 - m1 * m1
        sc1 = g1 * jax.lax.rsqrt(v1 + eps)
        sh1 = be1 - m1 * sc1
        h = jnp.maximum(h_pre * sc1 + sh1, 0.0)             # (NL, H) f32

        # --- ConvTranspose1d(H->H2, k=4, s=2, p=1) as even/odd phase streams ---
        # even out 2t   = h[t]@Wt1 + h[t-1]@Wt3
        # odd  out 2t+1 = h[t]@Wt2 + h[t+1]@Wt0     (bias absorbed by BN)
        e_pre = mm(h, wt[1]) + mm(shift_prev(h), wt[3])      # (NL, H2)
        o_pre = mm(h, wt[2]) + mm(shift_next(h), wt[0])      # (NL, H2)

        # --- BatchNorm1d(H2) over the full length-2L sequence + ReLU ---
        inv2 = 1.0 / float(2 * NL)
        m2 = (jnp.sum(e_pre, axis=0, keepdims=True)
              + jnp.sum(o_pre, axis=0, keepdims=True)) * inv2
        sq2 = (jnp.sum(e_pre * e_pre, axis=0, keepdims=True)
               + jnp.sum(o_pre * o_pre, axis=0, keepdims=True)) * inv2
        v2 = sq2 - m2 * m2
        sc2 = g2 * jax.lax.rsqrt(v2 + eps)
        sh2 = be2 - m2 * sc2
        e = jnp.maximum(e_pre * sc2 + sh2, 0.0)              # (NL, H2)
        o = jnp.maximum(o_pre * sc2 + sh2, 0.0)

        # --- Conv1d(H2->2, k=3, pad=1) on the interleaved even/odd sequence ---
        # Output lanes [e_ch0, e_ch1, o_ch0, o_ch1]; narrow store, no padding.
        y = (mm(shift_prev(o), w3[0]) + mm(e, w3[1])
             + mm(o, w3[2]) + mm(shift_next(e), w3[3]) + b3)
        out_ref[...] = y

    return kernel


def build_decoder(params):
    """Packs constants once and returns a jitted forward: x (N, F, L) -> (N, 2, 2L)."""
    consts, (F, H, H2), offs = _pack_decoder_consts(params)

    @jax.jit
    def decoder_fwd(x_ncl):
        N, _, L = x_ncl.shape
        NL = N * L
        x2d = jnp.transpose(x_ncl, (0, 2, 1)).reshape(NL, F).astype(jnp.float32)
        kernel = _make_kernel(N, L, F, H, H2, offs)
        out = pl.pallas_call(
            kernel,
            out_shape=jax.ShapeDtypeStruct((NL, 4), jnp.float32),
            in_specs=[pl.BlockSpec(memory_space=pltpu.MemorySpace.VMEM),
                      pl.BlockSpec(memory_space=pltpu.MemorySpace.VMEM)],
            out_specs=pl.BlockSpec(memory_space=pltpu.MemorySpace.VMEM),
            compiler_params=pltpu.CompilerParams(vmem_limit_bytes=32 * 1024 * 1024),
        )(x2d, consts)
        # un-interleave even/odd phases -> (N, 2, 2L); fused into the same jit.
        return out.reshape(N, L, 2, 2).transpose(0, 3, 1, 2).reshape(N, 2, 2 * L)

    return decoder_fwd


def decoder_ref(x_ncl, params):
    """Pure-JAX reference mirroring PyTorch semantics (training-mode BatchNorm)."""
    w1, b1, g1, be1, wt, bt, g2, be2, w3, b3 = params
    eps = 1e-5
    hp = jax.lax.Precision.HIGHEST

    def bn(h, g, b):
        m = h.mean(axis=(0, 2), keepdims=True)
        v = ((h - m) ** 2).mean(axis=(0, 2), keepdims=True)
        return (h - m) / jnp.sqrt(v + eps) * g[None, :, None] + b[None, :, None]

    h = jax.lax.conv_general_dilated(x_ncl, w1, (1,), [(1, 1)],
                                     dimension_numbers=('NCH', 'OIH', 'NCH'),
                                     precision=hp) + b1[None, :, None]
    h = jnp.maximum(bn(h, g1, be1), 0.0)

    wt_f = jnp.flip(wt, axis=2).transpose(1, 0, 2)  # (H2, H, 4) as OIH
    h = jax.lax.conv_general_dilated(h, wt_f, (1,), [(2, 2)], lhs_dilation=(2,),
                                     dimension_numbers=('NCH', 'OIH', 'NCH'),
                                     precision=hp) + bt[None, :, None]
    h = jnp.maximum(bn(h, g2, be2), 0.0)

    y = jax.lax.conv_general_dilated(h, w3, (1,), [(1, 1)],
                                     dimension_numbers=('NCH', 'OIH', 'NCH'),
                                     precision=hp) + b3[None, :, None]
    return y


if __name__ == "__main__":
    N, F, L = 2, 8, 16          # batch, feature_dim, sequence length
    H = 32                      # hidden_dim
    H2 = H // 2

    key = jax.random.PRNGKey(0)
    ks = jax.random.split(key, 11)
    params = (
        0.1 * jax.random.normal(ks[0], (H, F, 3), jnp.float32),    # conv1 weight
        0.1 * jax.random.normal(ks[1], (H,), jnp.float32),         # conv1 bias
        1.0 + 0.1 * jax.random.normal(ks[2], (H,), jnp.float32),   # bn1 gamma
        0.1 * jax.random.normal(ks[3], (H,), jnp.float32),         # bn1 beta
        0.1 * jax.random.normal(ks[4], (H, H2, 4), jnp.float32),   # convT weight (in,out,k)
        0.1 * jax.random.normal(ks[5], (H2,), jnp.float32),        # convT bias
        1.0 + 0.1 * jax.random.normal(ks[6], (H2,), jnp.float32),  # bn2 gamma
        0.1 * jax.random.normal(ks[7], (H2,), jnp.float32),        # bn2 beta
        0.1 * jax.random.normal(ks[8], (2, H2, 3), jnp.float32),   # conv3 weight
        0.1 * jax.random.normal(ks[9], (2,), jnp.float32),         # conv3 bias
    )
    x = jax.random.normal(ks[10], (N, F, L), jnp.float32)          # NCL, like PyTorch

    decoder = build_decoder(params)          # constants packed once, cached
    out = jax.block_until_ready(decoder(x))
    assert out.shape == (N, 2, 2 * L), out.shape

    ref = jax.block_until_ready(decoder_ref(x, params))
    # bf16 MXU operands (f32 accumulation / f32 reference at HIGHEST precision)
    # -> slightly relaxed tolerance vs. the pure-f32 variant.
    err = float(jnp.max(jnp.abs(out - ref)))
    assert jnp.allclose(out, ref, atol=3e-2, rtol=3e-2), err

    print("KERNEL_OK")
</pallas_src>

<mosaic_0001>
module attributes {stable_mosaic.version = 11 : i64} {
  func.func @kernel(%arg0: memref<32x8xf32, #tpu.memory_space<vmem>>, %arg1: memref<224x128xf32, #tpu.memory_space<vmem>>, %arg2: memref<32x4xf32, #tpu.memory_space<vmem>>) attributes {dimension_semantics = [], scalar_prefetch = 0 : i64, scratch_operands = 0 : i64, tpu.core_type = #tpu.core_type<tc>} {
    %c0 = arith.constant 0 : index
    %c0_0 = arith.constant 0 : index
    %0 = vector.load %arg1[%c0, %c0_0] : memref<224x128xf32, #tpu.memory_space<vmem>>, vector<8x32xf32>
    %1 = arith.truncf %0 : vector<8x32xf32> to vector<8x32xbf16>
    %c8 = arith.constant 8 : index
    %c0_1 = arith.constant 0 : index
    %2 = vector.load %arg1[%c8, %c0_1] : memref<224x128xf32, #tpu.memory_space<vmem>>, vector<8x32xf32>
    %3 = arith.truncf %2 : vector<8x32xf32> to vector<8x32xbf16>
    %c16 = arith.constant 16 : index
    %c0_2 = arith.constant 0 : index
    %4 = vector.load %arg1[%c16, %c0_2] : memref<224x128xf32, #tpu.memory_space<vmem>>, vector<8x32xf32>
    %5 = arith.truncf %4 : vector<8x32xf32> to vector<8x32xbf16>
    %c24 = arith.constant 24 : index
    %c0_3 = arith.constant 0 : index
    %6 = vector.load %arg1[%c24, %c0_3] : memref<224x128xf32, #tpu.memory_space<vmem>>, vector<32x16xf32>
    %7 = arith.truncf %6 : vector<32x16xf32> to vector<32x16xbf16>
    %c56 = arith.constant 56 : index
    %c0_4 = arith.constant 0 : index
    %8 = vector.load %arg1[%c56, %c0_4] : memref<224x128xf32, #tpu.memory_space<vmem>>, vector<32x16xf32>
    %9 = arith.truncf %8 : vector<32x16xf32> to vector<32x16xbf16>
    %c88 = arith.constant 88 : index
    %c0_5 = arith.constant 0 : index
    %10 = vector.load %arg1[%c88, %c0_5] : memref<224x128xf32, #tpu.memory_space<vmem>>, vector<32x16xf32>
    %11 = arith.truncf %10 : vector<32x16xf32> to vector<32x16xbf16>
    %c120 = arith.constant 120 : index
    %c0_6 = arith.constant 0 : index
    %12 = vector.load %arg1[%c120, %c0_6] : memref<224x128xf32, #tpu.memory_space<vmem>>, vector<32x16xf32>
    %13 = arith.truncf %12 : vector<32x16xf32> to vector<32x16xbf16>
    %c152 = arith.constant 152 : index
    %c0_7 = arith.constant 0 : index
    %14 = vector.load %arg1[%c152, %c0_7] : memref<224x128xf32, #tpu.memory_space<vmem>>, vector<16x4xf32>
    %15 = arith.truncf %14 : vector<16x4xf32> to vector<16x4xbf16>
    %c168 = arith.constant 168 : index
    %c0_8 = arith.constant 0 : index
    %16 = vector.load %arg1[%c168, %c0_8] : memref<224x128xf32, #tpu.memory_space<vmem>>, vector<16x4xf32>
    %17 = arith.truncf %16 : vector<16x4xf32> to vector<16x4xbf16>
    %c184 = arith.constant 184 : index
    %c0_9 = arith.constant 0 : index
    %18 = vector.load %arg1[%c184, %c0_9] : memref<224x128xf32, #tpu.memory_space<vmem>>, vector<16x4xf32>
    %19 = arith.truncf %18 : vector<16x4xf32> to vector<16x4xbf16>
    %c200 = arith.constant 200 : index
    %c0_10 = arith.constant 0 : index
    %20 = vector.load %arg1[%c200, %c0_10] : memref<224x128xf32, #tpu.memory_space<vmem>>, vector<16x4xf32>
    %21 = arith.truncf %20 : vector<16x4xf32> to vector<16x4xbf16>
    %c216 = arith.constant 216 : index
    %c0_11 = arith.constant 0 : index
    %22 = vector.load %arg1[%c216, %c0_11] : memref<224x128xf32, #tpu.memory_space<vmem>>, vector<1x32xf32>
    %c217 = arith.constant 217 : index
    %c0_12 = arith.constant 0 : index
    %23 = vector.load %arg1[%c217, %c0_12] : memref<224x128xf32, #tpu.memory_space<vmem>>, vector<1x32xf32>
    %c218 = arith.constant 218 : index
    %c0_13 = arith.constant 0 : index
    %24 = vector.load %arg1[%c218, %c0_13] : memref<224x128xf32, #tpu.memory_space<vmem>>, vector<1x16xf32>
    %c219 = arith.constant 219 : index
    %c0_14 = arith.constant 0 : index
    %25 = vector.load %arg1[%c219, %c0_14] : memref<224x128xf32, #tpu.memory_space<vmem>>, vector<1x16xf32>
    %c220 = arith.constant 220 : index
    %c0_15 = arith.constant 0 : index
    %26 = vector.load %arg1[%c220, %c0_15] : memref<224x128xf32, #tpu.memory_space<vmem>>, vector<1x4xf32>
    %27 = tpu.iota {dimensions = array<i32: 0>} : vector<32x1xi32>
    %c16_i32 = arith.constant 16 : i32
    %c0_i32 = arith.constant 0 : i32
    %28 = arith.cmpi eq, %c16_i32, %c0_i32 : i32
    %c1_i32 = arith.constant 1 : i32
    %29 = arith.select %28, %c1_i32, %c16_i32 : i32
    %30 = vector.broadcast %29 : i32 to vector<32x1xi32>
    %31 = arith.remsi %27, %30 : vector<32x1xi32>
    %c0_i32_16 = arith.constant 0 : i32
    %32 = vector.broadcast %c0_i32_16 : i32 to vector<32x1xi32>
    %33 = arith.cmpi ne, %31, %32 : vector<32x1xi32>
    %c0_i32_17 = arith.constant 0 : i32
    %34 = vector.broadcast %c0_i32_17 : i32 to vector<32x1xi32>
    %35 = arith.cmpi slt, %31, %34 : vector<32x1xi32>
    %c0_i32_18 = arith.constant 0 : i32
    %36 = arith.cmpi slt, %29, %c0_i32_18 : i32
    %37 = vector.broadcast %36 : i1 to vector<32x1xi1>
    %38 = vector.broadcast %37 : vector<32x1xi1> to vector<32x1xi1>
    %39 = arith.xori %35, %38 : vector<32x1xi1>
    %40 = arith.andi %39, %33 : vector<32x1xi1>
    %41 = vector.broadcast %29 : i32 to vector<32x1xi32>
    %42 = arith.addi %31, %41 : vector<32x1xi32>
    %43 = arith.select %40, %42, %31 : vector<32x1xi1>, vector<32x1xi32>
    %c0_i32_19 = arith.constant 0 : i32
    %44 = vector.broadcast %c0_i32_19 : i32 to vector<32x1xi32>
    %45 = arith.cmpi ne, %43, %44 : vector<32x1xi32>
    %c15_i32 = arith.constant 15 : i32
    %46 = vector.broadcast %c15_i32 : i32 to vector<32x1xi32>
    %47 = arith.cmpi ne, %43, %46 : vector<32x1xi32>
    %c0_20 = arith.constant 0 : index
    %c0_21 = arith.constant 0 : index
    %48 = vector.load %arg0[%c0_20, %c0_21] : memref<32x8xf32, #tpu.memory_space<vmem>>, vector<32x8xf32>
    %c1_i32_22 = arith.constant 1 : i32
    %49 = tpu.dynamic_rotate %48 by %c1_i32_22 dim 0 : vector<32x8xf32>, i32 -> vector<32x8xf32>
    %cst = arith.constant 0.000000e+00 : f32
    %50 = vector.shape_cast %45 : vector<32x1xi1> to vector<32x1xi1>
    %51 = vector.broadcast %50 : vector<32x1xi1> to vector<32x8xi1>
    %52 = vector.broadcast %cst : f32 to vector<32x8xf32>
    %53 = arith.select %51, %49, %52 : vector<32x8xi1>, vector<32x8xf32>
    %54 = arith.truncf %53 : vector<32x8xf32> to vector<32x8xbf16>
    %cst_23 = arith.constant dense<0.000000e+00> : vector<32x32xf32>
    %55 = tpu.matmul %54, %1, %cst_23 {dimension_numbers = #tpu.dot_dimension_numbers<[1], [0], [0], [1], [0, 0, 1, 1], [], []>} : vector<32x8xbf16>, vector<8x32xbf16>, vector<32x32xf32> -> vector<32x32xf32>
    %56 = arith.truncf %48 : vector<32x8xf32> to vector<32x8xbf16>
    %cst_24 = arith.constant dense<0.000000e+00> : vector<32x32xf32>
    %57 = tpu.matmul %56, %3, %cst_24 {dimension_numbers = #tpu.dot_dimension_numbers<[1], [0], [0], [1], [0, 0, 1, 1], [], []>} : vector<32x8xbf16>, vector<8x32xbf16>, vector<32x32xf32> -> vector<32x32xf32>
    %58 = arith.addf %55, %57 : vector<32x32xf32>
    %c31_i32 = arith.constant 31 : i32
    %59 = tpu.dynamic_rotate %48 by %c31_i32 dim 0 : vector<32x8xf32>, i32 -> vector<32x8xf32>
    %cst_25 = arith.constant 0.000000e+00 : f32
    %60 = vector.shape_cast %47 : vector<32x1xi1> to vector<32x1xi1>
    %61 = vector.broadcast %60 : vector<32x1xi1> to vector<32x8xi1>
    %62 = vector.broadcast %cst_25 : f32 to vector<32x8xf32>
    %63 = arith.select %61, %59, %62 : vector<32x8xi1>, vector<32x8xf32>
    %64 = arith.truncf %63 : vector<32x8xf32> to vector<32x8xbf16>
    %cst_26 = arith.constant dense<0.000000e+00> : vector<32x32xf32>
    %65 = tpu.matmul %64, %5, %cst_26 {dimension_numbers = #tpu.dot_dimension_numbers<[1], [0], [0], [1], [0, 0, 1, 1], [], []>} : vector<32x8xbf16>, vector<8x32xbf16>, vector<32x32xf32> -> vector<32x32xf32>
    %66 = arith.addf %58, %65 : vector<32x32xf32>
    %cst_27 = arith.constant dense<0.000000e+00> : vector<32xf32>
    %67 = vector.multi_reduction <add>, %66, %cst_27 [0] : vector<32x32xf32> to vector<32xf32>
    %68 = vector.shape_cast %67 : vector<32xf32> to vector<1x32xf32>
    %cst_28 = arith.constant 3.125000e-02 : f32
    %69 = vector.broadcast %cst_28 : f32 to vector<1x32xf32>
    %70 = arith.mulf %68, %69 : vector<1x32xf32>
    %71 = arith.mulf %66, %66 : vector<32x32xf32>
    %cst_29 = arith.constant dense<0.000000e+00> : vector<32xf32>
    %72 = vector.multi_reduction <add>, %71, %cst_29 [0] : vector<32x32xf32> to vector<32xf32>
    %73 = vector.shape_cast %72 : vector<32xf32> to vector<1x32xf32>
    %cst_30 = arith.constant 3.125000e-02 : f32
    %74 = vector.broadcast %cst_30 : f32 to vector<1x32xf32>
    %75 = arith.mulf %73, %74 : vector<1x32xf32>
    %76 = arith.mulf %70, %70 : vector<1x32xf32>
    %77 = arith.subf %75, %76 : vector<1x32xf32>
    %cst_31 = arith.constant 9.99999974E-6 : f32
    %78 = vector.broadcast %cst_31 : f32 to vector<1x32xf32>
    %79 = arith.addf %77, %78 : vector<1x32xf32>
    %80 = math.rsqrt %79 : vector<1x32xf32>
    %81 = arith.mulf %22, %80 : vector<1x32xf32>
    %82 = arith.mulf %70, %81 : vector<1x32xf32>
    %83 = arith.subf %23, %82 : vector<1x32xf32>
    %84 = vector.broadcast %81 : vector<1x32xf32> to vector<32x32xf32>
    %85 = arith.mulf %66, %84 : vector<32x32xf32>
    %86 = vector.broadcast %83 : vector<1x32xf32> to vector<32x32xf32>
    %87 = arith.addf %85, %86 : vector<32x32xf32>
    %cst_32 = arith.constant 0.000000e+00 : f32
    %88 = vector.broadcast %cst_32 : f32 to vector<32x32xf32>
    %89 = arith.maximumf %87, %88 : vector<32x32xf32>
    %90 = arith.truncf %89 : vector<32x32xf32> to vector<32x32xbf16>
    %cst_33 = arith.constant dense<0.000000e+00> : vector<32x16xf32>
    %91 = tpu.matmul %90, %9, %cst_33 {dimension_numbers = #tpu.dot_dimension_numbers<[1], [0], [0], [1], [0, 0, 1, 1], [], []>} : vector<32x32xbf16>, vector<32x16xbf16>, vector<32x16xf32> -> vector<32x16xf32>
    %c1_i32_34 = arith.constant 1 : i32
    %92 = tpu.dynamic_rotate %89 by %c1_i32_34 dim 0 : vector<32x32xf32>, i32 -> vector<32x32xf32>
    %cst_35 = arith.constant 0.000000e+00 : f32
    %93 = vector.shape_cast %45 : vector<32x1xi1> to vector<32x1xi1>
    %94 = vector.broadcast %93 : vector<32x1xi1> to vector<32x32xi1>
    %95 = vector.broadcast %cst_35 : f32 to vector<32x32xf32>
    %96 = arith.select %94, %92, %95 : vector<32x32xi1>, vector<32x32xf32>
    %97 = arith.truncf %96 : vector<32x32xf32> to vector<32x32xbf16>
    %cst_36 = arith.constant dense<0.000000e+00> : vector<32x16xf32>
    %98 = tpu.matmul %97, %13, %cst_36 {dimension_numbers = #tpu.dot_dimension_numbers<[1], [0], [0], [1], [0, 0, 1, 1], [], []>} : vector<32x32xbf16>, vector<32x16xbf16>, vector<32x16xf32> -> vector<32x16xf32>
    %99 = arith.addf %91, %98 : vector<32x16xf32>
    %100 = arith.truncf %89 : vector<32x32xf32> to vector<32x32xbf16>
    %cst_37 = arith.constant dense<0.000000e+00> : vector<32x16xf32>
    %101 = tpu.matmul %100, %11, %cst_37 {dimension_numbers = #tpu.dot_dimension_numbers<[1], [0], [0], [1], [0, 0, 1, 1], [], []>} : vector<32x32xbf16>, vector<32x16xbf16>, vector<32x16xf32> -> vector<32x16xf32>
    %c31_i32_38 = arith.constant 31 : i32
    %102 = tpu.dynamic_rotate %89 by %c31_i32_38 dim 0 : vector<32x32xf32>, i32 -> vector<32x32xf32>
    %cst_39 = arith.constant 0.000000e+00 : f32
    %103 = vector.shape_cast %47 : vector<32x1xi1> to vector<32x1xi1>
    %104 = vector.broadcast %103 : vector<32x1xi1> to vector<32x32xi1>
    %105 = vector.broadcast %cst_39 : f32 to vector<32x32xf32>
    %106 = arith.select %104, %102, %105 : vector<32x32xi1>, vector<32x32xf32>
    %107 = arith.truncf %106 : vector<32x32xf32> to vector<32x32xbf16>
    %cst_40 = arith.constant dense<0.000000e+00> : vector<32x16xf32>
    %108 = tpu.matmul %107, %7, %cst_40 {dimension_numbers = #tpu.dot_dimension_numbers<[1], [0], [0], [1], [0, 0, 1, 1], [], []>} : vector<32x32xbf16>, vector<32x16xbf16>, vector<32x16xf32> -> vector<32x16xf32>
    %109 = arith.addf %101, %108 : vector<32x16xf32>
    %cst_41 = arith.constant dense<0.000000e+00> : vector<16xf32>
    %110 = vector.multi_reduction <add>, %99, %cst_41 [0] : vector<32x16xf32> to vector<16xf32>
    %111 = vector.shape_cast %110 : vector<16xf32> to vector<1x16xf32>
    %cst_42 = arith.constant dense<0.000000e+00> : vector<16xf32>
    %112 = vector.multi_reduction <add>, %109, %cst_42 [0] : vector<32x16xf32> to vector<16xf32>
    %113 = vector.shape_cast %112 : vector<16xf32> to vector<1x16xf32>
    %114 = arith.addf %111, %113 : vector<1x16xf32>
    %cst_43 = arith.constant 1.562500e-02 : f32
    %115 = vector.broadcast %cst_43 : f32 to vector<1x16xf32>
    %116 = arith.mulf %114, %115 : vector<1x16xf32>
    %117 = arith.mulf %99, %99 : vector<32x16xf32>
    %cst_44 = arith.constant dense<0.000000e+00> : vector<16xf32>
    %118 = vector.multi_reduction <add>, %117, %cst_44 [0] : vector<32x16xf32> to vector<16xf32>
    %119 = vector.shape_cast %118 : vector<16xf32> to vector<1x16xf32>
    %120 = arith.mulf %109, %109 : vector<32x16xf32>
    %cst_45 = arith.constant dense<0.000000e+00> : vector<16xf32>
    %121 = vector.multi_reduction <add>, %120, %cst_45 [0] : vector<32x16xf32> to vector<16xf32>
    %122 = vector.shape_cast %121 : vector<16xf32> to vector<1x16xf32>
    %123 = arith.addf %119, %122 : vector<1x16xf32>
    %cst_46 = arith.constant 1.562500e-02 : f32
    %124 = vector.broadcast %cst_46 : f32 to vector<1x16xf32>
    %125 = arith.mulf %123, %124 : vector<1x16xf32>
    %126 = arith.mulf %116, %116 : vector<1x16xf32>
    %127 = arith.subf %125, %126 : vector<1x16xf32>
    %cst_47 = arith.constant 9.99999974E-6 : f32
    %128 = vector.broadcast %cst_47 : f32 to vector<1x16xf32>
    %129 = arith.addf %127, %128 : vector<1x16xf32>
    %130 = math.rsqrt %129 : vector<1x16xf32>
    %131 = arith.mulf %24, %130 : vector<1x16xf32>
    %132 = arith.mulf %116, %131 : vector<1x16xf32>
    %133 = arith.subf %25, %132 : vector<1x16xf32>
    %134 = vector.broadcast %131 : vector<1x16xf32> to vector<32x16xf32>
    %135 = arith.mulf %99, %134 : vector<32x16xf32>
    %136 = vector.broadcast %133 : vector<1x16xf32> to vector<32x16xf32>
    %137 = arith.addf %135, %136 : vector<32x16xf32>
    %cst_48 = arith.constant 0.000000e+00 : f32
    %138 = vector.broadcast %cst_48 : f32 to vector<32x16xf32>
    %139 = arith.maximumf %137, %138 : vector<32x16xf32>
    %140 = vector.broadcast %131 : vector<1x16xf32> to vector<32x16xf32>
    %141 = arith.mulf %109, %140 : vector<32x16xf32>
    %142 = vector.broadcast %133 : vector<1x16xf32> to vector<32x16xf32>
    %143 = arith.addf %141, %142 : vector<32x16xf32>
    %cst_49 = arith.constant 0.000000e+00 : f32
    %144 = vector.broadcast %cst_49 : f32 to vector<32x16xf32>
    %145 = arith.maximumf %143, %144 : vector<32x16xf32>
    %c1_i32_50 = arith.constant 1 : i32
    %146 = tpu.dynamic_rotate %145 by %c1_i32_50 dim 0 : vector<32x16xf32>, i32 -> vector<32x16xf32>
    %cst_51 = arith.constant 0.000000e+00 : f32
    %147 = vector.shape_cast %45 : vector<32x1xi1> to vector<32x1xi1>
    %148 = vector.broadcast %147 : vector<32x1xi1> to vector<32x16xi1>
    %149 = vector.broadcast %cst_51 : f32 to vector<32x16xf32>
    %150 = arith.select %148, %146, %149 : vector<32x16xi1>, vector<32x16xf32>
    %151 = arith.truncf %150 : vector<32x16xf32> to vector<32x16xbf16>
    %cst_52 = arith.constant dense<0.000000e+00> : vector<32x4xf32>
    %152 = tpu.matmul %151, %15, %cst_52 {dimension_numbers = #tpu.dot_dimension_numbers<[1], [0], [0], [1], [0, 0, 1, 1], [], []>} : vector<32x16xbf16>, vector<16x4xbf16>, vector<32x4xf32> -> vector<32x4xf32>
    %153 = arith.truncf %139 : vector<32x16xf32> to vector<32x16xbf16>
    %cst_53 = arith.constant dense<0.000000e+00> : vector<32x4xf32>
    %154 = tpu.matmul %153, %17, %cst_53 {dimension_numbers = #tpu.dot_dimension_numbers<[1], [0], [0], [1], [0, 0, 1, 1], [], []>} : vector<32x16xbf16>, vector<16x4xbf16>, vector<32x4xf32> -> vector<32x4xf32>
    %155 = arith.addf %152, %154 : vector<32x4xf32>
    %156 = arith.truncf %145 : vector<32x16xf32> to vector<32x16xbf16>
    %cst_54 = arith.constant dense<0.000000e+00> : vector<32x4xf32>
    %157 = tpu.matmul %156, %19, %cst_54 {dimension_numbers = #tpu.dot_dimension_numbers<[1], [0], [0], [1], [0, 0, 1, 1], [], []>} : vector<32x16xbf16>, vector<16x4xbf16>, vector<32x4xf32> -> vector<32x4xf32>
    %158 = arith.addf %155, %157 : vector<32x4xf32>
    %c31_i32_55 = arith.constant 31 : i32
    %159 = tpu.dynamic_rotate %139 by %c31_i32_55 dim 0 : vector<32x16xf32>, i32 -> vector<32x16xf32>
    %cst_56 = arith.constant 0.000000e+00 : f32
    %160 = vector.shape_cast %47 : vector<32x1xi1> to vector<32x1xi1>
    %161 = vector.broadcast %160 : vector<32x1xi1> to vector<32x16xi1>
    %162 = vector.broadcast %cst_56 : f32 to vector<32x16xf32>
    %163 = arith.select %161, %159, %162 : vector<32x16xi1>, vector<32x16xf32>
    %164 = arith.truncf %163 : vector<32x16xf32> to vector<32x16xbf16>
    %cst_57 = arith.constant dense<0.000000e+00> : vector<32x4xf32>
    %165 = tpu.matmul %164, %21, %cst_57 {dimension_numbers = #tpu.dot_dimension_numbers<[1], [0], [0], [1], [0, 0, 1, 1], [], []>} : vector<32x16xbf16>, vector<16x4xbf16>, vector<32x4xf32> -> vector<32x4xf32>
    %166 = arith.addf %158, %165 : vector<32x4xf32>
    %167 = vector.broadcast %26 : vector<1x4xf32> to vector<32x4xf32>
    %168 = arith.addf %166, %167 : vector<32x4xf32>
    %c0_58 = arith.constant 0 : index
    %c0_59 = arith.constant 0 : index
    %169 = vector.load %arg2[%c0_58, %c0_59] : memref<32x4xf32, #tpu.memory_space<vmem>>, vector<32x4xf32>
    tpu.vector_store %arg2[%c0_58, %c0_59], %168 {strides = array<i32>} : memref<32x4xf32, #tpu.memory_space<vmem>>, vector<32x4xf32>,
    return
  }
}

</mosaic_0001>

<bundles_post_ra>
// kernel: decoder_fwd.1
= control target key start
LH: loop header
LB: loop body
LE: loop exit
PB: predicated region body
PF: predicated region fallthrough
CT: control target
= control target key end

     0   :  { %7 = vsyncpa [#allocation3], 0  ;;  %s1218_s9 = smov [#allocation2]   ;;  %s1480_s0 = inlined_call_operand.vmem [shape: f32[32,8], index: 0, kind: input, shape index: {}]   ;;  %s1481_s1 = inlined_call_operand.hbm [shape: f32[224,128], index: 1, kind: input, shape index: {}]   ;;  %s1482_s2 = inlined_call_operand.vmem [shape: f32[32,4], index: 2, kind: output, shape index: {}]  }
   0x1   :  { %s15_s10 = sshll.u32 %s1218_s9, 4  ;;  %s16_s10 = int_to_ptr.vmem [resolvable:$true] %s15_s10 }
   0x2   :  { %s1204_s11 = scalar_lea.vmem %s16_s10, 3584  ;;  %p1209_p1 = scmp.lt.s32.totalorder %s16_s10, %s16_s10 }
   0x3   :  { %p1205_p0 = scmp.ne.s32.totalorder %s16_s10, %s1204_s11  ;;  %p1210_p2 = scmp.lt.s32.totalorder %s1204_s11, %s1204_s11 }
   0x5   :  { %p1211_p3 = por %p1210_p2, %p1209_p1 }
   0x7   :  { %p1212_p4 = pnand %p1211_p3, %p1205_p0 }
   0x9   :  { %1215 = shalt.err (!%p1212_p4)
}
   0xa   :  { %s1219_s12 = smov 128   ;;  %s1220_s13 = smov 8  }
   0xb   :  { %21 = dma.hbm_to_vmem [thread:$0]  %s1481_s1, 3584, %s16_s10, [#allocation3], %s1219_s12, %s1219_s12, %s1220_s13  }
   0xc   :  { %1216 = dma.done.wait [#allocation3], 3584  }
   0xd   :  { %1217 = vsyncadd [#allocation3], 4294963712  ;;  %v73_v0 = vlaneseq  ;;  %vm170_vm0 = vcmask 1043456   ;;  %vm163_vm1 = vcmask 64512   ;;  %v28_v7 = vld [vmem:[#allocation2 + $0x8] sm:$0xff]  ;;  %v26_v8 = vld [vmem:[#allocation2] sm:$0xff] }
   0xe   :  { %v134_v9 = vld [vmem:[%s1480_s0] sm:$0xff]  ;;  %v29_v13 = vpack.c.bf16 %v28_v7, %v28_v7  ;;  %v27_v14 = vpack.c.bf16 %v26_v8, %v26_v8  ;;  %v135_v15 = vld [vmem:[%s1480_s0 + $0x8] sm:$0xff]  ;;  %v136_v18 = vld [vmem:[%s1480_s0 + $0x10] sm:$0xff]  ;;  %vm366_vm8 = vcmask 261120   ;;  %vm670_vm9 = vcmask 130048  }
   0xf   :  { %v1239_v1 = vshrl.u32 %v73_v0, 7  ;;  %v138_v16 = vrot.slane %v134_v9, 7  ;;  %v281_v17 = vrot.slane %v134_v9, 1  ;;  %v137_v19 = vld [vmem:[%s1480_s0 + $0x18] sm:$0xff]  ;;  %v139_v20 = vrot.slane %v135_v15, 7  ;;  %v30_v24 = vld [vmem:[#allocation2 + $0x10] sm:$0xff] }
  0x10   :  { %v161_v21 = vpack.c.bf16 %v135_v15, %v134_v9  ;;  %v282_v22 = vrot.slane %v135_v15, 1  ;;  %v140_v23 = vrot.slane %v136_v18, 7  ;;  %1186 = vmatprep.subr.msk.bf16.mxu0 %vm170_vm0, %v29_v13  ;;  %v172_v25 = vsel %vm170_vm0, %v29_v13, 0  ;;  %1187 = vmatprep.subr.msk.bf16.mxu1 %vm170_vm0, %v27_v14  ;;  %v40_v52 = vld [vmem:[#allocation2 + $0x48] sm:$0xff]  ;;  %v41_v53 = vld [vmem:[#allocation2 + $0x50] sm:$0xff]  ;;  %v38_v57 = vld [vmem:[#allocation2 + $0x38] sm:$0xff] }
  0x11   :  { %v82_v2 = vand.u32 15, %v1239_v1  ;;  %v76_v3 = vadd.s32 16, %v1239_v1  ;;  %v75_v4 = vadd.s32 8, %v1239_v1  ;;  %v77_v5 = vadd.s32 24, %v1239_v1  ;;  %1113 = vmatpush3.bf16.msra.mxu0 %v172_v25  ;;  %v52_v55 = vld [vmem:[#allocation2 + $0x88] sm:$0xff]  ;;  %v53_v56 = vld [vmem:[#allocation2 + $0x90] sm:$0xff] }
  0x12   :  { %vm142_vm3 = vcmp.lt.s32.totalorder %v1239_v1, 1  ;;  %vm285_vm4 = vcmp.lt.s32.totalorder %v1239_v1, 7  ;;  %v230_v26 = vsel %vm170_vm0, %v27_v14, 0  ;;  %v162_v27 = vpack.c.bf16 %v137_v19, %v136_v18  ;;  %1114 = vmatprep.mubr.msk.bf16.mxu0 %vm163_vm1, %v161_v21  ;;  %v39_v59 = vld [vmem:[#allocation2 + $0x40] sm:$0xff]  ;;  %v50_v61 = vld [vmem:[#allocation2 + $0x78] sm:$0xff]  ;;  %v46_v0 = vld [vmem:[#allocation2 + $0x68] sm:$0xff] }
  0x13   :  { %vm1245_vm2 = vcmp.ne.s32.totalorder %v82_v2, 0  ;;  %v96_v10 = vand.u32 15, %v76_v3  ;;  %v89_v11 = vand.u32 15, %v75_v4  ;;  %v103_v12 = vand.u32 15, %v77_v5  ;;  %1119 = vmatpush3.bf16.msra.mxu1 %v230_v26  ;;  %v51_v62 = vld [vmem:[#allocation2 + $0x80] sm:$0xff]  ;;  %v47_v2 = vld [vmem:[#allocation2 + $0x70] sm:$0xff] }
  0x14   :  { %v283_v28 = vrot.slane %v136_v18, 1  ;;  %v284_v29 = vrot.slane %v137_v19, 1  ;;  %v141_v30 = vrot.slane %v137_v19, 7  ;;  %v145_v31 = vsel %vm142_vm3, %v138_v16, %v139_v20  ;;  %1115 = vmatmul.mubr.msk.bf16.vlgmr.msra.gmra.mxu0 %vm163_vm1, %v162_v27  ;;  %v34_v4 = vld [vmem:[#allocation2 + $0x28] sm:$0xff]  ;;  %v35_v5 = vld [vmem:[#allocation2 + $0x30] sm:$0xff] }
  0x15   :  { %v31_v32 = vpack.c.bf16 %v30_v24, %v30_v24  ;;  %vm1270_vm5 = vcmp.ne.s32.totalorder %v96_v10, 0  ;;  %v144_v34 = vsel %vm142_vm3, %v139_v20, %v140_v23  ;;  %vm1276_vm6 = vcmp.ne.s32.totalorder %v89_v11, 15 }
  0x16   :  { %v287_v36 = vsel %vm285_vm4, %v282_v22, %v283_v28  ;;  %v146_v37 = vsel %vm142_vm3, %v141_v30, %v138_v16  ;;  %v143_v38 = vsel %vm142_vm3, %v140_v23, %v141_v30  ;;  %v157_v39 = vsel %vm1270_vm5, %v144_v34, 0.0 }
  0x17   :  { %1188 = vmatprep.subr.msk.bf16.mxu0 %vm170_vm0, %v31_v32  ;;  %v311_v40 = vsel %vm170_vm0, %v31_v32, 0  ;;  %v155_v41 = vsel %vm1245_vm2, %v146_v37, 0.0  ;;  %v160_v42 = vpack.c.bf16 %v143_v38, %v157_v39  ;;  %v288_v43 = vsel %vm285_vm4, %v281_v17, %v282_v22 }
  0x18   :  { %v299_v44 = vsel %vm1276_vm6, %v287_v36, 0.0  ;;  %v159_v45 = vpack.c.bf16 %v145_v31, %v155_v41  ;;  %1125 = vmatpush3.bf16.msra.mxu0 %v311_v40  ;;  %vm1297_vm7 = vcmp.ne.s32.totalorder %v103_v12, 15  ;;  %v286_v48 = vsel %vm285_vm4, %v283_v28, %v284_v29 }
  0x19   :  { %v302_v46 = vpack.c.bf16 %v299_v44, %v288_v43  ;;  %v289_v49 = vsel %vm285_vm4, %v284_v29, %v281_v17  ;;  %v43_v54 = vpack.c.bf16 %v41_v53, %v40_v52  ;;  %v55_v58 = vpack.c.bf16 %v53_v56, %v52_v55 }
  0x1a   :  { %1120 = vmatprep.mubr.msk.bf16.mxu1 %vm163_vm1, %v159_v45  ;;  %v301_v50 = vsel %vm1297_vm7, %v289_v49, 0.0  ;;  %v42_v60 = vpack.c.bf16 %v39_v59, %v38_v57  ;;  %v54_v63 = vpack.c.bf16 %v51_v62, %v50_v61  ;;  %v1311_v3 = vpack.c.bf16 %v47_v2, %v46_v0 }
  0x1b   :  { %1126 = vmatprep.mubr.msk.bf16.mxu0 %vm163_vm1, %v302_v46  ;;  %1121 = vmatmul.mubr.msk.bf16.vlgmr.msra.gmra.mxu1 %vm163_vm1, %v160_v42  ;;  %v303_v51 = vpack.c.bf16 %v301_v50, %v286_v48  ;;  %v1314_v7 = vpack.c.bf16 %v35_v5, %v34_v4  ;;  %v68_v4 = vld [vmem:[#allocation2 + $0xd8] sm:$0x1]  ;;  %v1326_v5 = vsub.s32 0, %v1239_v1  ;;  %vm1042_vm10 = vcmask 31744  }
  0x1c   :  { %1138 = vmatprep.subr.bf16.mxu0 %v43_v54  ;;  %1130 = vmatprep.subr.bf16.mxu1 %v55_v58 }
  0x1d   :  { %1127 = vmatmul.mubr.msk.bf16.vlgmr.msra.gmra.mxu0 %vm163_vm1, %v303_v51  ;;  %1131 = vmatpush3.bf16.msra.mxu1 %v55_v58 }
  0x1e   :  { %1139 = vmatpush3.bf16.msra.mxu0 %v43_v54  ;;  %1132 = vmatprep.subr.bf16.mxu1 %v54_v63 }
  0x1f   :  { %1140 = vmatprep.subr.bf16.mxu0 %v42_v60 }
  0x21   :  { %1133 = vmatpush3.bf16.msra.mxu1 %v54_v63 }
  0x22   :  { %1141 = vmatpush3.bf16.msra.mxu0 %v42_v60  ;;  %1146 = vmatprep.subr.bf16.mxu1 %v1314_v7 }
  0x23   :  { %1154 = vmatprep.subr.bf16.mxu0 %v1311_v3 }
  0xd4   :  { %v1116_v8 = vpop.f32.mrf.mxu0 }
  0xd6   :  { %v208_v9 = vpop.f32.mrf.mxu0 }
  0xd8   :  { %v1117_v11 = vpop.f32.mrf.mxu0 }
  0xda   :  { %v211_v13 = vpop.f32.mrf.mxu0 }
  0xdb   :  { %v1122_v10 = vpop.f32.mrf.mxu1 }
  0xdc   :  { %v275_v19 = vadd.f32 %v1122_v10, %v1116_v8  ;;  %v69_v10 = vld [vmem:[#allocation2 + $0xd9] sm:$0x1] }
  0xdd   :  { %v266_v12 = vpop.f32.mrf.mxu1  ;;  %v1128_v15 = vpop.f32.mrf.mxu0 }
  0xde   :  { %v267_v16 = vadd.f32 %v266_v12, %v208_v9  ;;  %v364_v24 = vadd.f32 %v1128_v15, %v275_v19 }
  0xdf   :  { %v1123_v14 = vpop.f32.mrf.mxu1  ;;  %v347_v18 = vpop.f32.mrf.mxu0 }
  0xe0   :  { %v362_v20 = vadd.f32 %v347_v18, %v267_v16  ;;  %v278_v22 = vadd.f32 %v1123_v14, %v1117_v11  ;;  %v383_v29 = vmul.f32 %v364_v24, %v364_v24  ;;  %v370_v36 = vsel %vm366_vm8, %v364_v24, 0.0 }
  0xe1   :  { %v269_v17 = vpop.f32.mrf.mxu1  ;;  %v1129_v21 = vpop.f32.mrf.mxu0 }
  0xe2   :  { %v270_v23 = vadd.f32 %v269_v17, %v211_v13  ;;  %v381_v26 = vmul.f32 %v362_v20, %v362_v20  ;;  %v365_v27 = vadd.f32 %v1129_v21, %v278_v22  ;;  %v367_v30 = vsel %vm366_vm8, %v362_v20, 0.0 }
  0xe3   :  { %v350_v25 = vpop.f32.mrf.mxu0  ;;  %v388_v42 = vsel %vm366_vm8, %v383_v29, 0.0 }
  0xe4   :  { %v363_v28 = vadd.f32 %v350_v25, %v270_v23  ;;  %v385_v37 = vsel %vm366_vm8, %v381_v26, 0.0  ;;  %v384_v38 = vmul.f32 %v365_v27, %v365_v27  ;;  %v372_v43 = vsel %vm366_vm8, %v365_v27, 0.0  ;;  %v44_v25 = vld [vmem:[#allocation2 + $0x58] sm:$0xff]  ;;  %v45_v26 = vld [vmem:[#allocation2 + $0x60] sm:$0xff] }
  0xe6   :  { %v368_v31 = vsel %vm366_vm8, %v363_v28, 0.0  ;;  %v382_v32 = vmul.f32 %v363_v28, %v363_v28  ;;  %v390_v46 = vsel %vm366_vm8, %v384_v38, 0.0 }
  0xe7   :  { %v369_v34 = vadd.f32 %v368_v31, %v367_v30 }
  0xe8   :  { %v386_v39 = vsel %vm366_vm8, %v382_v32, 0.0 }
  0xe9   :  { %v371_v40 = vadd.f32 %v370_v36, %v369_v34  ;;  %v387_v41 = vadd.f32 %v386_v39, %v385_v37  ;;  %v48_v34 = vpack.c.bf16 %v45_v26, %v44_v25 }
  0xeb   :  { %v373_v44 = vadd.f32 %v372_v43, %v371_v40  ;;  %v389_v45 = vadd.f32 %v388_v42, %v387_v41 }
  0xed   :  { %v374_v48 = vrot.slane %v373_v44, 4  ;;  %v391_v49 = vadd.f32 %v390_v46, %v389_v45  ;;  %v32_v46 = vld [vmem:[#allocation2 + $0x18] sm:$0xff] }
  0xef   :  { %v375_v50 = vadd.f32 %v374_v48, %v373_v44  ;;  %v392_v51 = vrot.slane %v391_v49, 4  ;;  %v33_v48 = vld [vmem:[#allocation2 + $0x20] sm:$0xff] }
  0xf1   :  { %v376_v52 = vrot.slane %v375_v50, 2  ;;  %v393_v53 = vadd.f32 %v392_v51, %v391_v49 }
  0xf3   :  { %v377_v54 = vadd.f32 %v376_v52, %v375_v50  ;;  %v394_v55 = vrot.slane %v393_v53, 2 }
  0xf5   :  { %v378_v56 = vrot.slane %v377_v54, 1  ;;  %v395_v57 = vadd.f32 %v394_v55, %v393_v53  ;;  %v36_v55 = vpack.c.bf16 %v33_v48, %v32_v46 }
  0xf7   :  { %v379_v58 = vadd.f32 %v378_v56, %v377_v54  ;;  %v396_v59 = vrot.slane %v395_v57, 1 }
  0xf9   :  { %v380_v60 = vmul.f32 0.03125, %v379_v58  ;;  %v397_v61 = vadd.f32 %v396_v59, %v395_v57 }
  0xfb   :  { %v398_v62 = vmul.f32 0.03125, %v397_v61  ;;  %v399_v63 = vmul.f32 %v380_v60, %v380_v60  ;;  %v59_v61 = vld [vmem:[#allocation2 + $0xa8] sm:$0xff] }
  0xfd   :  { %v400_v0 = vsub.f32 %v398_v62, %v399_v63  ;;  %v60_v62 = vld [vmem:[#allocation2 + $0xb0] sm:$0xff] }
  0xfe   :  { %v61_v63 = vpack.c.bf16 %v60_v62, %v59_v61 }
  0xff   :  { %v401_v2 = vadd.f32 1e-05, %v400_v0  ;;  %v56_v0 = vld [vmem:[#allocation2 + $0x98] sm:$0xff] }
 0x101   :  { %1192 = vrsqrt.f32 %v401_v2 }
 0x10e   :  { %v1193_v8 = vpop.eup %1192 }
 0x10f   :  { %v403_v9 = vmul.f32 %v1193_v8, %v68_v4  ;;  %v62_v4 = vld [vmem:[#allocation2 + $0xb8] sm:$0xff]  ;;  %v63_v8 = vld [vmem:[#allocation2 + $0xc0] sm:$0xff] }
 0x111   :  { %v404_v11 = vmul.f32 %v403_v9, %v380_v60  ;;  %v409_v12 = vrot.slane %v403_v9, %v1326_v5  ;;  %v1364_v9 = vpack.c.bf16 %v63_v8, %v62_v4 }
 0x113   :  { %v405_v13 = vsub.f32 %v69_v10, %v404_v11  ;;  %v411_v14 = vmul.f32 %v409_v12, %v363_v28  ;;  %v410_v16 = vmul.f32 %v409_v12, %v362_v20  ;;  %v412_v17 = vmul.f32 %v409_v12, %v364_v24  ;;  %v65_v10 = vld [vmem:[#allocation2 + $0xc8] sm:$0xff]  ;;  %v66_v11 = vld [vmem:[#allocation2 + $0xd0] sm:$0xff] }
 0x114   :  { %v413_v18 = vmul.f32 %v409_v12, %v365_v27  ;;  %v1367_v12 = vpack.c.bf16 %v66_v11, %v65_v10 }
 0x115   :  { %v417_v15 = vrot.slane %v405_v13, %v1326_v5 }
 0x117   :  { %v419_v19 = vadd.f32 %v417_v15, %v411_v14  ;;  %v418_v21 = vadd.f32 %v417_v15, %v410_v16  ;;  %v420_v22 = vadd.f32 %v417_v15, %v412_v17  ;;  %v421_v23 = vadd.f32 %v417_v15, %v413_v18 }
 0x119   :  { %v423_v29 = vmax.f32 %v419_v19, 0.0  ;;  %v422_v30 = vmax.f32 %v418_v21, 0.0  ;;  %v424_v31 = vmax.f32 %v420_v22, 0.0  ;;  %v425_v32 = vmax.f32 %v421_v23, 0.0 }
 0x11b   :  { %v429_v36 = vrot.slane %v423_v29, 7  ;;  %v553_v37 = vrot.slane %v423_v29, 1  ;;  %v426_v38 = vpack.c.bf16 %v423_v29, %v422_v30  ;;  %v427_v28 = vpack.c.bf16 %v425_v32, %v424_v31 }
 0x11c   :  { %v428_v39 = vrot.slane %v422_v30, 7  ;;  %v431_v40 = vrot.slane %v425_v32, 7  ;;  %v430_v20 = vrot.slane %v424_v31, 7  ;;  %v552_v24 = vrot.slane %v422_v30, 1 }
 0x11d   :  { %1142 = vmatprep.mubr.msk.bf16.mxu0 %vm366_vm8, %v426_v38  ;;  %v554_v27 = vrot.slane %v424_v31, 1  ;;  %v555_v41 = vrot.slane %v425_v32, 1 }
 0x11e   :  { %1143 = vmatmul.mubr.msk.bf16.vlgmr.msra.gmra.mxu0 %vm366_vm8, %v427_v28  ;;  %v434_v42 = vsel %vm142_vm3, %v428_v39, %v429_v36  ;;  %v435_v43 = vsel %vm142_vm3, %v431_v40, %v428_v39  ;;  %v432_v44 = vsel %vm142_vm3, %v430_v20, %v431_v40  ;;  %v433_v45 = vsel %vm142_vm3, %v429_v36, %v430_v20 }
 0x11f   :  { %1155 = vmatpush3.bf16.msra.mxu0 %v1311_v3  ;;  %1158 = vmatprep.mubr.msk.bf16.mxu0 %vm366_vm8, %v426_v38  ;;  %v436_v49 = vsel %vm1245_vm2, %v435_v43, 0.0  ;;  %v438_v50 = vsel %vm1270_vm5, %v433_v45, 0.0  ;;  %v557_v51 = vsel %vm285_vm4, %v553_v37, %v554_v27  ;;  %v558_v52 = vsel %vm285_vm4, %v552_v24, %v553_v37 }
 0x120   :  { %v440_v53 = vpack.c.bf16 %v434_v42, %v436_v49  ;;  %v441_v54 = vpack.c.bf16 %v432_v44, %v438_v50  ;;  %1156 = vmatprep.subr.bf16.mxu0 %v48_v34  ;;  %v561_v3 = vsel %vm1276_vm6, %v557_v51, 0.0  ;;  %v559_v57 = vsel %vm285_vm4, %v555_v41, %v552_v24 }
 0x121   :  { %v564_v56 = vpack.c.bf16 %v561_v3, %v558_v52  ;;  %v556_v58 = vsel %vm285_vm4, %v554_v27, %v555_v41  ;;  %v563_v59 = vsel %vm1297_vm7, %v559_v57, 0.0 }
 0x122   :  { %1134 = vmatprep.mubr.msk.bf16.mxu1 %vm366_vm8, %v440_v53  ;;  %v565_v60 = vpack.c.bf16 %v563_v59, %v556_v58 }
 0x123   :  { %1135 = vmatmul.mubr.msk.bf16.vlgmr.msra.gmra.mxu1 %vm366_vm8, %v441_v54  ;;  %1157 = vmatpush3.bf16.msra.mxu0 %v48_v34 }
 0x124   :  { %1147 = vmatpush3.bf16.msra.mxu1 %v1314_v7  ;;  %1150 = vmatprep.mubr.msk.bf16.mxu1 %vm366_vm8, %v564_v56  ;;  %v57_v7 = vld [vmem:[#allocation2 + $0xa0] sm:$0xff] }
 0x125   :  { %1148 = vmatprep.subr.bf16.mxu1 %v36_v55  ;;  %v58_v2 = vpack.c.bf16 %v57_v7, %v56_v0 }
 0x126   :  { %1159 = vmatmul.mubr.msk.bf16.vlgmr.msra.gmra.mxu0 %vm366_vm8, %v427_v28 }
 0x127   :  { %1168 = vmatprep.subr.bf16.mxu0 %v58_v2 }
 0x128   :  { %1149 = vmatpush3.bf16.msra.mxu1 %v36_v55  ;;  %1169 = vmatpush3.bf16.msra.mxu0 %v58_v2 }
 0x129   :  { %1162 = vmatprep.subr.bf16.mxu1 %v61_v63  ;;  %1180 = vmatprep.subr.bf16.mxu0 %v1367_v12 }
 0x12b   :  { %1151 = vmatmul.mubr.msk.bf16.vlgmr.msra.gmra.mxu1 %vm366_vm8, %v565_v60 }
 0x12c   :  { %1163 = vmatpush3.bf16.msra.mxu1 %v61_v63 }
 0x12d   :  { %1174 = vmatprep.subr.bf16.mxu1 %v1364_v9 }
 0x1de   :  { %v1144_v13 = vpop.f32.mrf.mxu0 }
 0x1e0   :  { %v537_v14 = vpop.f32.mrf.mxu0 }
 0x1e2   :  { %v1145_v15 = vpop.f32.mrf.mxu0 }
 0x1e3   :  { %v1136_v16 = vpop.f32.mrf.mxu1 }
 0x1e4   :  { %v540_v17 = vpop.f32.mrf.mxu0  ;;  %v1372_v23 = vadd.f32 %v1144_v13, %v1136_v16 }
 0x1e5   :  { %v482_v18 = vpop.f32.mrf.mxu1 }
 0x1e6   :  { %v1370_v19 = vadd.f32 %v537_v14, %v482_v18  ;;  %v1160_v21 = vpop.f32.mrf.mxu0  ;;  %v701_v34 = vmul.f32 %v1372_v23, %v1372_v23  ;;  %v674_v28 = vsel %vm670_vm9, %v1372_v23, 0.0 }
 0x1e7   :  { %v1137_v22 = vpop.f32.mrf.mxu1 }
 0x1e8   :  { %v655_v26 = vpop.f32.mrf.mxu0  ;;  %v699_v29 = vmul.f32 %v1370_v19, %v1370_v19  ;;  %v1376_v30 = vadd.f32 %v1145_v15, %v1137_v22  ;;  %v671_v36 = vsel %vm670_vm9, %v1370_v19, 0.0  ;;  %v706_v46 = vsel %vm670_vm9, %v701_v34, 0.0 }
 0x1e9   :  { %v485_v25 = vpop.f32.mrf.mxu1 }
 0x1ea   :  { %v1378_v31 = vadd.f32 %v540_v17, %v485_v25  ;;  %v1161_v40 = vpop.f32.mrf.mxu0  ;;  %v703_v24 = vsel %vm670_vm9, %v699_v29, 0.0  ;;  %v702_v27 = vmul.f32 %v1376_v30, %v1376_v30  ;;  %v676_v48 = vsel %vm670_vm9, %v1376_v30, 0.0 }
 0x1eb   :  { %v1152_v32 = vpop.f32.mrf.mxu1 }
 0x1ec   :  { %v672_v37 = vsel %vm670_vm9, %v1378_v31, 0.0  ;;  %v700_v38 = vmul.f32 %v1378_v31, %v1378_v31  ;;  %v1399_v49 = vadd.f32 %v1160_v21, %v1152_v32  ;;  %v658_v52 = vpop.f32.mrf.mxu0  ;;  %v708_v54 = vsel %vm670_vm9, %v702_v27, 0.0 }
 0x1ed   :  { %v673_v39 = vadd.f32 %v672_v37, %v671_v36  ;;  %v606_v20 = vpop.f32.mrf.mxu1 }
 0x1ee   :  { %v704_v41 = vsel %vm670_vm9, %v700_v38, 0.0  ;;  %v1394_v42 = vadd.f32 %v655_v26, %v606_v20  ;;  %v718_v59 = vmul.f32 %v1399_v49, %v1399_v49  ;;  %v687_v2 = vsel %vm670_vm9, %v1399_v49, 0.0 }
 0x1ef   :  { %v675_v43 = vadd.f32 %v674_v28, %v673_v39  ;;  %v705_v44 = vadd.f32 %v704_v41, %v703_v24  ;;  %v1153_v45 = vpop.f32.mrf.mxu1 }
 0x1f0   :  { %v716_v3 = vmul.f32 %v1394_v42, %v1394_v42  ;;  %v1404_v55 = vadd.f32 %v1161_v40, %v1153_v45  ;;  %v684_v60 = vsel %vm670_vm9, %v1394_v42, 0.0  ;;  %v723_v15 = vsel %vm670_vm9, %v718_v59, 0.0 }
 0x1f1   :  { %v677_v50 = vadd.f32 %v676_v48, %v675_v43  ;;  %v707_v51 = vadd.f32 %v706_v46, %v705_v44  ;;  %v609_v53 = vpop.f32.mrf.mxu1 }
 0x1f2   :  { %v659_v56 = vadd.f32 %v658_v52, %v609_v53  ;;  %v720_v4 = vsel %vm670_vm9, %v716_v3, 0.0  ;;  %v719_v8 = vmul.f32 %v1404_v55, %v1404_v55  ;;  %v689_v16 = vsel %vm670_vm9, %v1404_v55, 0.0 }
 0x1f3   :  { %v678_v57 = vrot.slane %v677_v50, 4  ;;  %v709_v58 = vadd.f32 %v708_v54, %v707_v51 }
 0x1f4   :  { %v685_v61 = vsel %vm670_vm9, %v659_v56, 0.0  ;;  %v717_v62 = vmul.f32 %v659_v56, %v659_v56  ;;  %v725_v22 = vsel %vm670_vm9, %v719_v8, 0.0 }
 0x1f5   :  { %v679_v63 = vadd.f32 %v678_v57, %v677_v50  ;;  %v710_v0 = vrot.slane %v709_v58, 4  ;;  %v686_v7 = vadd.f32 %v685_v61, %v684_v60  ;;  %v71_v61 = vld [vmem:[#allocation2 + $0xdb] sm:$0x1] }
 0x1f6   :  { %v721_v10 = vsel %vm670_vm9, %v717_v62, 0.0 }
 0x1f7   :  { %v711_v11 = vadd.f32 %v710_v0, %v709_v58  ;;  %v688_v13 = vadd.f32 %v687_v2, %v686_v7  ;;  %v722_v14 = vadd.f32 %v721_v10, %v720_v4  ;;  %v680_v17 = vrot.slane %v679_v63, 2  ;;  %v70_v58 = vld [vmem:[#allocation2 + $0xda] sm:$0x1] }
 0x1f9   :  { %v690_v18 = vadd.f32 %v689_v16, %v688_v13  ;;  %v724_v21 = vadd.f32 %v723_v15, %v722_v14  ;;  %v712_v25 = vrot.slane %v711_v11, 2  ;;  %v681_v32 = vadd.f32 %v680_v17, %v679_v63 }
 0x1fb   :  { %v691_v26 = vrot.slane %v690_v18, 4  ;;  %v726_v29 = vadd.f32 %v725_v22, %v724_v21  ;;  %v713_v37 = vadd.f32 %v712_v25, %v711_v11  ;;  %v682_v39 = vrot.slane %v681_v32, 1 }
 0x1fd   :  { %v692_v34 = vadd.f32 %v691_v26, %v690_v18  ;;  %v727_v36 = vrot.slane %v726_v29, 4  ;;  %v714_v24 = vrot.slane %v713_v37, 1  ;;  %v683_v43 = vadd.f32 %v682_v39, %v681_v32 }
 0x1ff   :  { %v693_v38 = vrot.slane %v692_v34, 2  ;;  %v728_v28 = vadd.f32 %v727_v36, %v726_v29  ;;  %v715_v46 = vadd.f32 %v714_v24, %v713_v37 }
 0x201   :  { %v694_v40 = vadd.f32 %v693_v38, %v692_v34  ;;  %v729_v20 = vrot.slane %v728_v28, 2 }
 0x203   :  { %v695_v27 = vrot.slane %v694_v40, 1  ;;  %v730_v41 = vadd.f32 %v729_v20, %v728_v28 }
 0x205   :  { %v696_v44 = vadd.f32 %v695_v27, %v694_v40  ;;  %v731_v45 = vrot.slane %v730_v41, 1 }
 0x207   :  { %v697_v48 = vadd.f32 %v696_v44, %v683_v43  ;;  %v732_v50 = vadd.f32 %v731_v45, %v730_v41 }
 0x209   :  { %v698_v51 = vmul.f32 0.015625, %v697_v48  ;;  %v733_v52 = vadd.f32 %v732_v50, %v715_v46 }
 0x20b   :  { %v734_v53 = vmul.f32 0.015625, %v733_v52  ;;  %v735_v54 = vmul.f32 %v698_v51, %v698_v51 }
 0x20d   :  { %v736_v3 = vsub.f32 %v734_v53, %v735_v54 }
 0x20f   :  { %v737_v57 = vadd.f32 1e-05, %v736_v3 }
 0x211   :  { %1194 = vrsqrt.f32 %v737_v57 }
 0x21e   :  { %v1195_v59 = vpop.eup %1194 }
 0x21f   :  { %v739_v60 = vmul.f32 %v1195_v59, %v70_v58 }
 0x221   :  { %v740_v62 = vmul.f32 %v739_v60, %v698_v51  ;;  %v745_v63 = vrot.slane %v739_v60, %v1326_v5 }
 0x223   :  { %v741_v0 = vsub.f32 %v71_v61, %v740_v62  ;;  %v763_v7 = vmul.f32 %v745_v63, %v659_v56  ;;  %v746_v4 = vmul.f32 %v745_v63, %v1370_v19  ;;  %v747_v8 = vmul.f32 %v745_v63, %v1378_v31 }
 0x224   :  { %v748_v10 = vmul.f32 %v745_v63, %v1372_v23  ;;  %v749_v11 = vmul.f32 %v745_v63, %v1376_v30  ;;  %v762_v13 = vmul.f32 %v745_v63, %v1394_v42  ;;  %v765_v14 = vmul.f32 %v745_v63, %v1404_v55 }
 0x225   :  { %v753_v2 = vrot.slane %v741_v0, %v1326_v5  ;;  %v764_v15 = vmul.f32 %v745_v63, %v1399_v49 }
 0x227   :  { %v767_v16 = vadd.f32 %v763_v7, %v753_v2  ;;  %v754_v17 = vadd.f32 %v753_v2, %v746_v4  ;;  %v755_v18 = vadd.f32 %v753_v2, %v747_v8  ;;  %v756_v56 = vadd.f32 %v753_v2, %v748_v10  ;;  %v1074_v10 = vld [vmem:[#allocation2 + $0xdc] ss:$0 sm:$0xff] }
 0x228   :  { %v757_v21 = vadd.f32 %v753_v2, %v749_v11  ;;  %v766_v5 = vadd.f32 %v762_v13, %v753_v2  ;;  %v769_v22 = vadd.f32 %v765_v14, %v753_v2  ;;  %v768_v19 = vadd.f32 %v764_v15, %v753_v2 }
 0x229   :  { %v771_v25 = vmax.f32 %v767_v16, 0.0  ;;  %v758_v31 = vmax.f32 %v754_v17, 0.0  ;;  %v759_v26 = vmax.f32 %v755_v18, 0.0  ;;  %v760_v23 = vmax.f32 %v756_v56, 0.0 }
 0x22a   :  { %v761_v29 = vmax.f32 %v757_v21, 0.0  ;;  %v770_v30 = vmax.f32 %v766_v5, 0.0  ;;  %v773_v32 = vmax.f32 %v769_v22, 0.0  ;;  %v772_v42 = vmax.f32 %v768_v19, 0.0 }
 0x22b   :  { %v775_v34 = vrot.slane %v771_v25, 7  ;;  %v788_v55 = vpack.c.bf16 %v759_v26, %v758_v31  ;;  %v961_v36 = vrot.slane %v758_v31, 1  ;;  %v962_v49 = vrot.slane %v759_v26, 1 }
 0x22c   :  { %v789_v37 = vpack.c.bf16 %v761_v29, %v760_v23  ;;  %v774_v38 = vrot.slane %v770_v30, 7  ;;  %v900_v28 = vpack.c.bf16 %v771_v25, %v770_v30  ;;  %v777_v39 = vrot.slane %v773_v32, 7 }
 0x22d   :  { %1164 = vmatprep.mubr.msk.bf16.mxu1 %vm670_vm9, %v788_v55  ;;  %v776_v40 = vrot.slane %v772_v42, 7  ;;  %v963_v20 = vrot.slane %v760_v23, 1  ;;  %v964_v27 = vrot.slane %v761_v29, 1  ;;  %v967_v50 = vsel %vm285_vm4, %v961_v36, %v962_v49 }
 0x22e   :  { %1165 = vmatmul.mubr.msk.bf16.vlgmr.msra.gmra.mxu1 %vm670_vm9, %v789_v37  ;;  %v780_v24 = vsel %vm142_vm3, %v774_v38, %v775_v34  ;;  %v781_v41 = vsel %vm142_vm3, %v777_v39, %v774_v38  ;;  %v901_v6 = vpack.c.bf16 %v773_v32, %v772_v42 }
 0x22f   :  { %1176 = vmatprep.mubr.msk.bf16.mxu1 %vm670_vm9, %v900_v28  ;;  %1175 = vmatpush3.bf16.msra.mxu1 %v1364_v9  ;;  %v778_v43 = vsel %vm142_vm3, %v776_v40, %v777_v39  ;;  %v779_v44 = vsel %vm142_vm3, %v775_v34, %v776_v40  ;;  %v782_v45 = vsel %vm1245_vm2, %v781_v41, 0.0  ;;  %v966_v48 = vsel %vm285_vm4, %v962_v49, %v963_v20 }
 0x230   :  { %v784_v46 = vsel %vm1270_vm5, %v779_v44, 0.0  ;;  %v786_v51 = vpack.c.bf16 %v780_v24, %v782_v45  ;;  %v970_v52 = vsel %vm1276_vm6, %v966_v48, 0.0  ;;  %v968_v33 = vsel %vm285_vm4, %v964_v27, %v961_v36 }
 0x231   :  { %v787_v9 = vpack.c.bf16 %v778_v43, %v784_v46  ;;  %v973_v53 = vpack.c.bf16 %v970_v52, %v967_v50  ;;  %v965_v54 = vsel %vm285_vm4, %v963_v20, %v964_v27  ;;  %v972_v35 = vsel %vm1297_vm7, %v968_v33, 0.0 }
 0x232   :  { %1170 = vmatprep.mubr.msk.bf16.mxu0 %vm670_vm9, %v786_v51  ;;  %v974_v3 = vpack.c.bf16 %v972_v35, %v965_v54 }
 0x233   :  { %1171 = vmatmul.mubr.msk.bf16.vlgmr.msra.gmra.mxu0 %vm670_vm9, %v787_v9 }
 0x234   :  { %1181 = vmatpush3.bf16.msra.mxu0 %v1367_v12  ;;  %1182 = vmatprep.mubr.msk.bf16.mxu0 %vm670_vm9, %v973_v53 }
 0x236   :  { %1177 = vmatmul.mubr.msk.bf16.vlgmr.msra.gmra.mxu1 %vm670_vm9, %v901_v6 }
 0x23b   :  { %1183 = vmatmul.mubr.msk.bf16.vlgmr.msra.gmra.mxu0 %vm670_vm9, %v974_v3 }
 0x2ee   :  { %v1166_v57 = vpop.f32.mrf.mxu1 }
 0x2f0   :  { %v830_v58 = vpop.f32.mrf.mxu1 }
 0x2f2   :  { %v1167_v59 = vpop.f32.mrf.mxu1 }
 0x2f3   :  { %v1172_v60 = vpop.f32.mrf.mxu0 }
 0x2f4   :  { %v833_v61 = vpop.f32.mrf.mxu1  ;;  %v894_v7 = vadd.f32 %v1172_v60, %v1166_v57 }
 0x2f5   :  { %v885_v62 = vpop.f32.mrf.mxu0 }
 0x2f6   :  { %v1178_v12 = vpop.f32.mrf.mxu1  ;;  %v886_v1 = vadd.f32 %v885_v62, %v830_v58 }
 0x2f7   :  { %v1173_v63 = vpop.f32.mrf.mxu0  ;;  %v959_v8 = vadd.f32 %v1178_v12, %v894_v7 }
 0x2f8   :  { %v942_v0 = vpop.f32.mrf.mxu1  ;;  %v897_v11 = vadd.f32 %v1173_v63, %v1167_v59 }
 0x2f9   :  { %v888_v2 = vpop.f32.mrf.mxu0  ;;  %v957_v13 = vadd.f32 %v942_v0, %v886_v1 }
 0x2fa   :  { %v1179_v4 = vpop.f32.mrf.mxu1  ;;  %v889_v17 = vadd.f32 %v888_v2, %v833_v61 }
 0x2fb   :  { %v1184_v47 = vpop.f32.mrf.mxu0  ;;  %v960_v18 = vadd.f32 %v1179_v4, %v897_v11 }
 0x2fc   :  { %v1032_v14 = vadd.f32 %v1184_v47, %v959_v8  ;;  %v945_v15 = vpop.f32.mrf.mxu1 }
 0x2fd   :  { %v1015_v16 = vpop.f32.mrf.mxu0  ;;  %v958_v22 = vadd.f32 %v945_v15, %v889_v17 }
 0x2fe   :  { %v1040_v56 = vadd.f32 %v1074_v10, %v1032_v14  ;;  %v1030_v21 = vadd.f32 %v1015_v16, %v957_v13 }
 0x2ff   :  { %v1185_v5 = vpop.f32.mrf.mxu0 }
 0x300   :  { %1045 = vst.msk [vmem:[%s1482_s2 + $0x10] sm:$0xff] %vm1042_vm10, %v1040_v56  ;;  %v1038_v19 = vadd.f32 %v1074_v10, %v1030_v21  ;;  %v1033_v25 = vadd.f32 %v1185_v5, %v960_v18 }
 0x301   :  { %v1018_v31 = vpop.f32.mrf.mxu0 }
 0x302   :  { %1043 = vst.msk [vmem:[%s1482_s2] sm:$0xff] %vm1042_vm10, %v1038_v19  ;;  %v1041_v26 = vadd.f32 %v1074_v10, %v1033_v25  ;;  %v1031_v23 = vadd.f32 %v1018_v31, %v958_v22 }
 0x304   :  { %1046 = vst.msk [vmem:[%s1482_s2 + $0x18] sm:$0xff] %vm1042_vm10, %v1041_v26  ;;  %v1039_v29 = vadd.f32 %v1074_v10, %v1031_v23 }
 0x306   :  { %1044 = vst.msk [vmem:[%s1482_s2 + $0x8] sm:$0xff] %vm1042_vm10, %v1039_v29 }
 0x307   :  { %1051 = vsyncpa [#allocation3], 1 }

</bundles_post_ra>
